<compile_context>
chip_gen: v5e
topology: v5e:2x2
jax: 0.10.0
libtpu: 0.0.40
codegen_flags: <defaults>
</compile_context>

<pallas_src>
import math
from functools import partial

import jax
import jax.numpy as jnp
from jax.experimental import pallas as pl
from jax.experimental.pallas import tpu as pltpu


# --------------------------------------------------------------------------- #
# Kernels
# --------------------------------------------------------------------------- #
def _broadcast_pe(pe_blk, batch):
    """(ts, d) pe tile -> (ts*batch, d) rows matching x.reshape(S*B, D) ordering."""
    ts, d = pe_blk.shape
    if batch == 1:
        return pe_blk
    return jnp.broadcast_to(pe_blk[:, None, :], (ts, batch, d)).reshape(ts * batch, d)


def _pe_add_kernel(x_ref, pe_ref, o_ref, *, batch):
    x = x_ref[...]                                   # (ts*batch, d)
    pe_b = _broadcast_pe(pe_ref[...].astype(x.dtype), batch)
    o_ref[...] = (x + pe_b).astype(o_ref.dtype)


def _pe_add_dropout_kernel(x_ref, pe_ref, keep_ref, o_ref, *, batch, scale):
    x = x_ref[...]                                   # (ts*batch, d)
    pe_b = _broadcast_pe(pe_ref[...].astype(x.dtype), batch)
    y = (x + pe_b) * (keep_ref[...] * scale)         # inverted dropout
    o_ref[...] = y.astype(o_ref.dtype)


# --------------------------------------------------------------------------- #
# Positional-encoding buffer (same math as the PyTorch __init__)
# --------------------------------------------------------------------------- #
def make_pe_buffer(d_model, max_len=5000):
    position = jnp.arange(max_len, dtype=jnp.float32)[:, None]              # (L, 1)
    div_term = jnp.exp(
        jnp.arange(0, d_model, 2, dtype=jnp.float32) * (-math.log(10000.0) / d_model)
    )                                                                       # (D/2,)
    angles = position * div_term                                            # (L, D/2)
    pe = jnp.zeros((max_len, 1, d_model), dtype=jnp.float32)
    pe = pe.at[:, 0, 0::2].set(jnp.sin(angles))
    pe = pe.at[:, 0, 1::2].set(jnp.cos(angles))
    return pe


# --------------------------------------------------------------------------- #
# Tiling helper
# --------------------------------------------------------------------------- #
def _choose_seq_tile(S, B, D, itemsize, target_bytes=2 * 1024 * 1024):
    """Largest multiple-of-8 sequence tile that divides S and keeps the per-step
    x block around `target_bytes` (double-buffered in/out then fits comfortably
    inside the 16/32 MiB scoped-VMEM defaults on v5e/v6e/v7x)."""
    per_pos = max(1, B * D * itemsize)
    cap = min(S, (target_bytes // per_pos) // 8 * 8)
    best = None
    t = 8
    while t <= cap:
        if S % t == 0:
            best = t
        t += 8
    return best if best is not None else S


# --------------------------------------------------------------------------- #
# Wrapper
# --------------------------------------------------------------------------- #
def positional_encoding(x, pe, *, p=0.1, train=False, rng_key=None):
    """x: (S, B, D).  pe: (max_len, 1, D).  Returns (S, B, D) in x.dtype."""
    S, B, D = x.shape
    max_len = pe.shape[0]
    assert S <= max_len, "sequence longer than positional-encoding buffer"

    if train and p >= 1.0:
        return jnp.zeros_like(x)
    use_dropout = bool(train) and p > 0.0
    if use_dropout and rng_key is None:
        raise ValueError("train-mode dropout requires rng_key")

    # Free (metadata-only) reshapes to a lane-dense 2-D layout.
    x2 = x.reshape(S * B, D)
    pe2 = pe.reshape(max_len, D)

    itemsize = jnp.dtype(x.dtype).itemsize
    ts = _choose_seq_tile(S, B, D, itemsize)
    if ts % 8 != 0 and ts != max_len:
        # Fallback (tiny / ragged S): make the pe block a full-extent block.
        pe2 = pe2[:S]
    grid = (S // ts,)

    x_spec = pl.BlockSpec((ts * B, D), lambda i: (i, 0))
    pe_spec = pl.BlockSpec((ts, D), lambda i: (i, 0))
    out_spec = pl.BlockSpec((ts * B, D), lambda i: (i, 0))

    cparams = pltpu.CompilerParams(
        dimension_semantics=("parallel",),          # shards grid over v7x's 2 TCs
        vmem_limit_bytes=32 * 1024 * 1024,
    )
    out_shape = jax.ShapeDtypeStruct((S * B, D), x.dtype)

    if use_dropout:
        keep = jax.random.bernoulli(rng_key, 1.0 - p, (S, B, D)).astype(x.dtype)
        keep2 = keep.reshape(S * B, D)
        y2 = pl.pallas_call(
            partial(_pe_add_dropout_kernel, batch=B, scale=float(1.0 / (1.0 - p))),
            out_shape=out_shape,
            grid=grid,
            in_specs=[x_spec, pe_spec, x_spec],
            out_specs=out_spec,
            compiler_params=cparams,
        )(x2, pe2, keep2)
    else:
        y2 = pl.pallas_call(
            partial(_pe_add_kernel, batch=B),
            out_shape=out_shape,
            grid=grid,
            in_specs=[x_spec, pe_spec],
            out_specs=out_spec,
            compiler_params=cparams,
        )(x2, pe2)

    return y2.reshape(S, B, D)


# --------------------------------------------------------------------------- #
# Main
# --------------------------------------------------------------------------- #
if __name__ == "__main__":
    S, B, D = 8, 2, 32          # seq_len, batch, d_model (small demo shapes)
    MAX_LEN = 64
    P = 0.1

    key = jax.random.PRNGKey(0)
    k_x, k_drop = jax.random.split(key)
    x = jax.random.normal(k_x, (S, B, D), dtype=jnp.float32)
    pe = make_pe_buffer(D, MAX_LEN)

    # Eval mode (dropout = identity) — verify against the reference.
    y_eval = jax.block_until_ready(positional_encoding(x, pe, p=P, train=False))
    ref_eval = x + pe[:S]
    assert y_eval.shape == (S, B, D)
    assert jnp.allclose(y_eval, ref_eval, atol=1e-6), "eval-mode mismatch vs reference"

    # Train mode (inverted dropout with a deterministic keep-mask) — verify too.
    y_train = jax.block_until_ready(
        positional_encoding(x, pe, p=P, train=True, rng_key=k_drop)
    )
    keep = jax.random.bernoulli(k_drop, 1.0 - P, (S, B, D)).astype(x.dtype)
    ref_train = (x + pe[:S]) * (keep * (1.0 / (1.0 - P)))
    assert y_train.shape == (S, B, D)
    assert jnp.allclose(y_train, ref_train, atol=1e-5), "train-mode mismatch vs reference"

    print("KERNEL_OK")
</pallas_src>

<mosaic_0001>
module attributes {stable_mosaic.version = 11 : i64} {
  func.func @_pe_add_kernel(%arg0: i32, %arg1: memref<16x32xf32, #tpu.memory_space<vmem>>, %arg2: memref<8x32xf32, #tpu.memory_space<vmem>>, %arg3: memref<16x32xf32, #tpu.memory_space<vmem>>) attributes {dimension_semantics = [#tpu.dimension_semantics<parallel>], iteration_bounds = array<i64: 1>, scalar_prefetch = 0 : i64, scratch_operands = 0 : i64, tpu.core_type = #tpu.core_type<tc>, window_params = [{transform_indices = @transform_0, window_bounds = array<i64: 16, 32>}, {transform_indices = @transform_1, window_bounds = array<i64: 8, 32>}, {transform_indices = @transform_2, window_bounds = array<i64: 16, 32>}]} {
    %c0 = arith.constant 0 : index
    %c0_0 = arith.constant 0 : index
    %0 = vector.load %arg1[%c0, %c0_0] : memref<16x32xf32, #tpu.memory_space<vmem>>, vector<16x32xf32>
    %c0_1 = arith.constant 0 : index
    %c0_2 = arith.constant 0 : index
    %1 = vector.load %arg2[%c0_1, %c0_2] : memref<8x32xf32, #tpu.memory_space<vmem>>, vector<8x32xf32>
    %2 = vector.shape_cast %1 : vector<8x32xf32> to vector<8x1x32xf32>
    %3 = vector.shape_cast %2 : vector<8x1x32xf32> to vector<8x1x32xf32>
    %4 = vector.broadcast %3 : vector<8x1x32xf32> to vector<8x2x32xf32>
    %5 = vector.shape_cast %4 : vector<8x2x32xf32> to vector<16x32xf32>
    %6 = arith.addf %0, %5 : vector<16x32xf32>
    %c0_3 = arith.constant 0 : index
    %c0_4 = arith.constant 0 : index
    %7 = vector.load %arg3[%c0_3, %c0_4] : memref<16x32xf32, #tpu.memory_space<vmem>>, vector<16x32xf32>
    tpu.vector_store %arg3[%c0_3, %c0_4], %6 {strides = array<i32>} : memref<16x32xf32, #tpu.memory_space<vmem>>, vector<16x32xf32>,
    return
  }
  func.func @transform_0(%arg0: i32) -> (i32, i32) {
    %c0_i32 = arith.constant 0 : i32
    %c0_i32_0 = arith.constant 0 : i32
    return %arg0, %c0_i32 : i32, i32
  }
  func.func @transform_1(%arg0: i32) -> (i32, i32) {
    %c0_i32 = arith.constant 0 : i32
    %c0_i32_0 = arith.constant 0 : i32
    return %arg0, %c0_i32 : i32, i32
  }
  func.func @transform_2(%arg0: i32) -> (i32, i32) {
    %c0_i32 = arith.constant 0 : i32
    %c0_i32_0 = arith.constant 0 : i32
    return %arg0, %c0_i32 : i32, i32
  }
}

</mosaic_0001>

<bundles_post_ra>
// kernel: tpu_custom_call.1
= control target key start
LH: loop header
LB: loop body
LE: loop exit
PB: predicated region body
PF: predicated region fallthrough
CT: control target
= control target key end

     0   :  { %s132_s0 = inlined_call_operand.vmem [shape: f32[16,32], index: 0, kind: input, shape index: {}]   ;;  %s133_s1 = inlined_call_operand.vmem [shape: f32[64,32], index: 1, kind: input, shape index: {}]   ;;  %s134_s2 = inlined_call_operand.hbm [shape: f32[16,32], index: 2, kind: output, shape index: {}]  }
   0x1   :  { %v14_v0 = vld [vmem:[%s133_s1] sm:$0xff] }
   0x2   :  { %v23_v1 = vperm.slane %v14_v0, 0  ;;  %v16_v2 = vrot.slane %v14_v0, 1  ;;  %v17_v3 = vrot.slane %v14_v0, 2  ;;  %v18_v4 = vrot.slane %v14_v0, 3 }
   0x3   :  { %7 = vsyncpa [#allocation3], 0  ;;  %v19_v5 = vrot.slane %v14_v0, 4  ;;  %v20_v6 = vrot.slane %v14_v0, 5  ;;  %v21_v7 = vrot.slane %v14_v0, 6  ;;  %v22_v11 = vrot.slane %v14_v0, 7 }
   0x4   :  { %31 = vst [vmem:[#allocation1] ss:$4 sm:$0xff] %v23_v1  ;;  %v24_v8 = vperm.slane %v16_v2, 0  ;;  %v25_v9 = vperm.slane %v17_v3, 0  ;;  %v26_v10 = vperm.slane %v18_v4, 0  ;;  %v12_v16 = vld [vmem:[%s132_s0] sm:$0xff] }
   0x5   :  { %v27_v12 = vperm.slane %v19_v5, 0  ;;  %v28_v13 = vperm.slane %v20_v6, 0  ;;  %v29_v14 = vperm.slane %v21_v7, 0  ;;  %v30_v15 = vperm.slane %v22_v11, 0  ;;  %s61_s14 = sshll.u32 %s134_s2, 4  ;;  %v13_v19 = vld [vmem:[%s132_s0 + $0x8] sm:$0xff]  ;;  %s62_s14 = int_to_ptr.hbm [resolvable:$true] %s61_s14 }
   0x6   :  { %33 = vst [vmem:[#allocation1 + $0x1] ss:$4 sm:$0xff] %v24_v8  ;;  %vm52_vm0 = vcmask 261120   ;;  %s102_s17 = smov [#allocation2]   ;;  %s103_s19 = smov 128  }
   0x7   :  { %35 = vst [vmem:[#allocation1 + $0x2] ss:$4 sm:$0xff] %v25_v9  ;;  %s59_s18 = sshll.u32 %s102_s17, 4  ;;  %s104_s20 = smov 8   ;;  %s60_s18 = int_to_ptr.vmem [resolvable:$true] %s59_s18 }
   0x8   :  { %37 = vst [vmem:[#allocation1 + $0x3] ss:$4 sm:$0xff] %v26_v10 }
   0x9   :  { %39 = vst [vmem:[#allocation1 + $0x20] ss:$4 sm:$0xff] %v27_v12 }
   0xa   :  { %41 = vst [vmem:[#allocation1 + $0x21] ss:$4 sm:$0xff] %v28_v13 }
   0xb   :  { %43 = vst [vmem:[#allocation1 + $0x22] ss:$4 sm:$0xff] %v29_v14 }
   0xc   :  { %45 = vst [vmem:[#allocation1 + $0x23] ss:$4 sm:$0xff] %v30_v15 }
   0xf   :  { %v46_v17 = vld.sshfl [vmem:[#allocation1] sm:$0xff pattern:$0x73625140] }
  0x10   :  { %v50_v18 = vadd.f32 %v46_v17, %v12_v16 }
  0x12   :  { %53 = vst.msk [vmem:[#allocation2] sm:$0xff] %vm52_vm0, %v50_v18 }
  0x13   :  { %v47_v20 = vld.sshfl [vmem:[#allocation1 + $0x20] sm:$0xff pattern:$0x73625140] }
  0x14   :  { %v51_v21 = vadd.f32 %v47_v20, %v13_v19 }
  0x16   :  { %54 = vst.msk [vmem:[#allocation2 + $0x8] sm:$0xff] %vm52_vm0, %v51_v21 }
  0x17   :  { %67 = dma.vmem_to_hbm [thread:$0]  %s60_s18, 256, %s62_s14, [#allocation3], %s103_s19, %s103_s19, %s104_s20  }
  0x18   :  { %100 = dma.done.wait [#allocation3], 256  }
  0x19   :  { %101 = vsyncadd [#allocation3], 4294967040 }
  0x1a   :  { %72 = vsyncpa [#allocation3], 1 }

</bundles_post_ra>
